<compile_context>
chip_gen: v5e
topology: v5e:2x2
jax: 0.10.0
libtpu: 0.0.40
codegen_flags: <defaults>
</compile_context>

<pallas_src>
import jax
import jax.numpy as jnp
from jax.experimental import pallas as pl
from jax.experimental.pallas import tpu as pltpu

TIMESCALE = 1.0
_TARGET_TILE_BYTES = 8 << 20     # ~8 MiB x-tile: near the measured HBM-roofline sweet spot
_VMEM_HEADROOM = 12 << 20        # leave for compiler scratch on the 64 MiB (v7x) part


def _round_up(n, m):
    return ((n + m - 1) // m) * m


def _hbnode_kernel(scale_ref, x_ref, w_ref, b_ref, out_ref):
    """Fused HeavyBallNODE derivative on one batch tile.

    scale_ref : SMEM (1,)   f32     timescale * sigmoid(gamma), precomputed
    x_ref     : VMEM (TB, 2*D)      [theta | m] lane-dense slab (f32 or bf16)
    w_ref     : VMEM (D, D) bf16    df linear weight (resident across grid)
    b_ref     : VMEM (1, D) f32     df linear bias
    out_ref   : VMEM (TB, 2*D)      [dtheta | dm]
    """
    d = w_ref.shape[0]

    theta = x_ref[:, :d]                       # lane-aligned slice (D % 128 == 0)
    m = x_ref[:, d:].astype(jnp.float32)

    # df(t, theta) = tanh(theta @ W + b): bf16 MXU inputs, f32 accumulation,
    # bias-add / tanh / subtract all in f32 (v5e-friendly elementwise path).
    f = jnp.tanh(
        jnp.dot(theta.astype(w_ref.dtype), w_ref[...],
                preferred_element_type=jnp.float32)
        + b_ref[...]
    )

    scale = scale_ref[0]
    out_ref[:, :d] = (-m).astype(out_ref.dtype)            # dtheta (Identity act)
    out_ref[:, d:] = (f - scale * m).astype(out_ref.dtype)  # dm


def _vmem_capacity_bytes():
    try:
        info = pltpu.get_tpu_info()
        cap = int(getattr(info, "vmem_capacity_bytes", 0))
        if cap > 0:
            return cap
    except Exception:
        pass
    return 64 << 20   # conservative (v7x-sized) fallback


def heavyball_node_forward(t, x, w, b, gamma, timescale=TIMESCALE):
    """x: [batch, 2, dim] -> [batch, 2, dim] (same dtype as x).

    t is unused by the synthetic df (kept for API parity with the nn.Module).
    """
    del t
    batch, two, dim = x.shape
    assert two == 2
    assert dim % 128 == 0, "dim must be a multiple of 128 (lane alignment)"

    io_dtype = x.dtype
    io_bytes = jnp.dtype(io_dtype).itemsize

    # [B, 2, D] -> [B, 2*D]: contiguous, free; theta in cols [:D], m in [D:].
    x2d = x.reshape(batch, 2 * dim)

    w_bf16 = w.astype(jnp.bfloat16)                 # MXU operand, halves W VMEM
    b2d = b.reshape(1, dim).astype(jnp.float32)
    resident_bytes = dim * dim * 2 + 8 * dim * 4    # W (bf16) + padded bias

    # ---- batch-tile sizing (generation-aware VMEM budget, megacore-aware) ----
    vmem_cap = _vmem_capacity_bytes()
    row_bytes = 2 * dim * io_bytes
    avail = max(vmem_cap - _VMEM_HEADROOM - resident_bytes, 4 << 20)
    tb_vmem = max((avail // (4 * row_bytes)) // 8 * 8, 8)        # x+out double-buffered
    tb_target = max((_TARGET_TILE_BYTES // row_bytes) // 8 * 8, 8)
    tb_mega = max(_round_up(-(-batch // 2), 8), 8)               # >= 2 grid steps (v7x 2 TCs)
    tb = int(min(tb_target, tb_vmem, tb_mega, _round_up(batch, 8)))

    grid = (pl.cdiv(batch, tb),)   # ragged last block masked by Pallas; no pad/slice passes

    # Scalar hoist: timescale * sigmoid(gamma), done once outside the grid.
    scale = (timescale * jax.nn.sigmoid(gamma.reshape(-1)[0])).astype(
        jnp.float32).reshape(1)

    # VMEM limit: double-buffered x/out tiles + resident W/bias + slack, with
    # headroom below the physical capacity of this generation.
    vmem_needed = 4 * tb * row_bytes + resident_bytes + (4 << 20)
    vmem_limit = int(min(max(vmem_needed, 16 << 20), vmem_cap - (8 << 20)))

    cost = pl.CostEstimate(
        flops=2 * batch * dim * dim,
        transcendentals=batch * dim,
        bytes_accessed=2 * batch * 2 * dim * io_bytes + dim * dim * 2 + dim * 4,
    )

    def _run(single_buffer_weights):
        if single_buffer_weights:
            w_spec = pl.BlockSpec((dim, dim), lambda i: (0, 0),
                                  pipeline_mode=pl.Buffered(1))
            b_spec = pl.BlockSpec((1, dim), lambda i: (0, 0),
                                  pipeline_mode=pl.Buffered(1))
        else:
            w_spec = pl.BlockSpec((dim, dim), lambda i: (0, 0))
            b_spec = pl.BlockSpec((1, dim), lambda i: (0, 0))
        return pl.pallas_call(
            _hbnode_kernel,
            out_shape=jax.ShapeDtypeStruct((batch, 2 * dim), io_dtype),
            grid=grid,
            in_specs=[
                pl.BlockSpec(memory_space=pltpu.SMEM),               # scale
                pl.BlockSpec((tb, 2 * dim), lambda i: (i, 0)),       # x tile
                w_spec,                                              # W (resident)
                b_spec,                                              # bias
            ],
            out_specs=pl.BlockSpec((tb, 2 * dim), lambda i: (i, 0)),  # out tile
            compiler_params=pltpu.CompilerParams(
                dimension_semantics=("parallel",),
                vmem_limit_bytes=vmem_limit,
            ),
            cost_estimate=cost,
        )(scale, x2d, w_bf16, b2d)

    try:
        out2d = _run(True)      # single-buffered grid-invariant W/bias (saves VMEM)
    except Exception:
        out2d = _run(False)     # conservative fallback: default double-buffering

    return out2d.reshape(batch, 2, dim)


def _reference_forward(t, x, w, b, gamma, timescale=TIMESCALE):
    """Pure-JAX reference mirroring the PyTorch forward (same bf16 MXU path)."""
    del t
    theta = x[:, 0, :]
    m = x[:, 1, :].astype(jnp.float32)
    dtheta = -m
    f = jnp.tanh(
        jnp.dot(theta.astype(jnp.bfloat16), w.astype(jnp.bfloat16),
                preferred_element_type=jnp.float32)
        + b
    )
    dm = f - timescale * jax.nn.sigmoid(gamma.reshape(-1)[0]) * m
    return jnp.stack([dtheta, dm], axis=1).astype(x.dtype)


if __name__ == "__main__":
    key = jax.random.PRNGKey(0)
    k_x, k_w, k_b = jax.random.split(key, 3)

    # batch=20, dim=128 -> tb=16, grid=(2,): exercises multi-step pipelining,
    # the megacore split, AND the ragged (masked) last block.
    batch, dim = 20, 128

    # deterministic parameter init (synthetic, not a checkpoint load)
    gamma = jnp.array([-3.0], dtype=jnp.float32)                 # nn.Parameter([-3.0])
    w = (jax.random.normal(k_w, (dim, dim), jnp.float32)
         * (1.0 / jnp.sqrt(dim)))                                # Linear weight
    b = jax.random.normal(k_b, (dim,), jnp.float32) * 0.01       # Linear bias

    x = jax.random.normal(k_x, (batch, 2, dim), jnp.float32)     # [theta m]
    t = jnp.zeros((1,), jnp.float32)

    out = jax.block_until_ready(heavyball_node_forward(t, x, w, b, gamma))
    ref = _reference_forward(t, x, w, b, gamma)

    assert out.shape == (batch, 2, dim)
    max_err = float(jnp.max(jnp.abs(out - ref)))
    assert jnp.allclose(out, ref, atol=2e-3, rtol=2e-3), max_err

    print("KERNEL_OK")
</pallas_src>

<mosaic_0001>
module attributes {stable_mosaic.version = 11 : i64} {
  func.func @_hbnode_kernel(%arg0: i32, %arg1: memref<1xf32, #tpu.memory_space<smem>>, %arg2: memref<16x256xf32, #tpu.memory_space<vmem>>, %arg3: memref<128x128xbf16, #tpu.memory_space<vmem>>, %arg4: memref<1x128xf32, #tpu.memory_space<vmem>>, %arg5: memref<16x256xf32, #tpu.memory_space<vmem>>) attributes {dimension_semantics = [#tpu.dimension_semantics<parallel>], iteration_bounds = array<i64: 2>, scalar_prefetch = 0 : i64, scratch_operands = 0 : i64, tpu.core_type = #tpu.core_type<tc>, window_params = [{transform_indices = @transform_0, window_bounds = array<i64: 1>}, {transform_indices = @transform_1, window_bounds = array<i64: 16, 256>}, {pipeline_mode = #tpu.pipeline_mode<synchronous>, transform_indices = @transform_2, window_bounds = array<i64: 128, 128>}, {pipeline_mode = #tpu.pipeline_mode<synchronous>, transform_indices = @transform_3, window_bounds = array<i64: 1, 128>}, {transform_indices = @transform_4, window_bounds = array<i64: 16, 256>}]} {
    %c0 = arith.constant 0 : index
    %c0_0 = arith.constant 0 : index
    %0 = vector.load %arg2[%c0, %c0_0] : memref<16x256xf32, #tpu.memory_space<vmem>>, vector<16x128xf32>
    %c0_1 = arith.constant 0 : index
    %c128 = arith.constant 128 : index
    %1 = vector.load %arg2[%c0_1, %c128] : memref<16x256xf32, #tpu.memory_space<vmem>>, vector<16x128xf32>
    %2 = arith.truncf %0 : vector<16x128xf32> to vector<16x128xbf16>
    %c0_2 = arith.constant 0 : index
    %c0_3 = arith.constant 0 : index
    %3 = vector.load %arg3[%c0_2, %c0_3] : memref<128x128xbf16, #tpu.memory_space<vmem>>, vector<128x128xbf16>
    %cst = arith.constant dense<0.000000e+00> : vector<16x128xf32>
    %4 = tpu.matmul %2, %3, %cst {dimension_numbers = #tpu.dot_dimension_numbers<[1], [0], [0], [1], [0, 0, 1, 1], [], []>} : vector<16x128xbf16>, vector<128x128xbf16>, vector<16x128xf32> -> vector<16x128xf32>
    %c0_4 = arith.constant 0 : index
    %c0_5 = arith.constant 0 : index
    %5 = vector.load %arg4[%c0_4, %c0_5] : memref<1x128xf32, #tpu.memory_space<vmem>>, vector<1x128xf32>
    %6 = vector.broadcast %5 : vector<1x128xf32> to vector<16x128xf32>
    %7 = arith.addf %4, %6 : vector<16x128xf32>
    %8 = math.tanh %7 : vector<16x128xf32>
    %c0_6 = arith.constant 0 : index
    %9 = memref.load %arg1[%c0_6] : memref<1xf32, #tpu.memory_space<smem>>
    %cst_7 = arith.constant 0.000000e+00 : f32
    %10 = vector.broadcast %cst_7 : f32 to vector<16x128xf32>
    %11 = arith.subf %10, %1 : vector<16x128xf32>
    %c0_8 = arith.constant 0 : index
    %c0_9 = arith.constant 0 : index
    %12 = vector.load %arg5[%c0_8, %c0_9] : memref<16x256xf32, #tpu.memory_space<vmem>>, vector<16x128xf32>
    tpu.vector_store %arg5[%c0_8, %c0_9], %11 {strides = array<i32>} : memref<16x256xf32, #tpu.memory_space<vmem>>, vector<16x128xf32>,
    %13 = vector.broadcast %9 : f32 to vector<16x128xf32>
    %14 = arith.mulf %13, %1 : vector<16x128xf32>
    %15 = arith.subf %8, %14 : vector<16x128xf32>
    %c0_10 = arith.constant 0 : index
    %c128_11 = arith.constant 128 : index
    %16 = vector.load %arg5[%c0_10, %c128_11] : memref<16x256xf32, #tpu.memory_space<vmem>>, vector<16x128xf32>
    tpu.vector_store %arg5[%c0_10, %c128_11], %15 {strides = array<i32>} : memref<16x256xf32, #tpu.memory_space<vmem>>, vector<16x128xf32>,
    return
  }
  func.func @transform_0(%arg0: i32) -> i32 {
    %c0_i32 = arith.constant 0 : i32
    %c0_i32_0 = arith.constant 0 : i32
    return %c0_i32 : i32
  }
  func.func @transform_1(%arg0: i32) -> (i32, i32) {
    %c0_i32 = arith.constant 0 : i32
    %c0_i32_0 = arith.constant 0 : i32
    return %arg0, %c0_i32 : i32, i32
  }
  func.func @transform_2(%arg0: i32) -> (i32, i32) {
    %c0_i32 = arith.constant 0 : i32
    %c0_i32_0 = arith.constant 0 : i32
    %c0_i32_1 = arith.constant 0 : i32
    return %c0_i32, %c0_i32_0 : i32, i32
  }
  func.func @transform_3(%arg0: i32) -> (i32, i32) {
    %c0_i32 = arith.constant 0 : i32
    %c0_i32_0 = arith.constant 0 : i32
    %c0_i32_1 = arith.constant 0 : i32
    return %c0_i32, %c0_i32_0 : i32, i32
  }
  func.func @transform_4(%arg0: i32) -> (i32, i32) {
    %c0_i32 = arith.constant 0 : i32
    %c0_i32_0 = arith.constant 0 : i32
    return %arg0, %c0_i32 : i32, i32
  }
}

module attributes {stable_mosaic.version = 11 : i64} {
  func.func @_hbnode_kernel(%arg0: i32, %arg1: memref<1xf32, #tpu.memory_space<smem>>, %arg2: memref<16x256xf32, #tpu.memory_space<vmem>>, %arg3: memref<128x128xbf16, #tpu.memory_space<vmem>>, %arg4: memref<1x128xf32, #tpu.memory_space<vmem>>, %arg5: memref<16x256xf32, #tpu.memory_space<vmem>>) attributes {dimension_semantics = [#tpu.dimension_semantics<parallel>], iteration_bounds = array<i64: 2>, scalar_prefetch = 0 : i64, scratch_operands = 0 : i64, tpu.core_type = #tpu.core_type<tc>, window_params = [{transform_indices = @transform_0, window_bounds = array<i64: 1>}, {transform_indices = @transform_1, window_bounds = array<i64: 16, 256>}, {pipeline_mode = #tpu.pipeline_mode<synchronous>, transform_indices = @transform_2, window_bounds = array<i64: 128, 128>}, {pipeline_mode = #tpu.pipeline_mode<synchronous>, transform_indices = @transform_3, window_bounds = array<i64: 1, 128>}, {transform_indices = @transform_4, window_bounds = array<i64: 16, 256>}]} {
    %c0 = arith.constant 0 : index
    %c0_0 = arith.constant 0 : index
    %0 = vector.load %arg2[%c0, %c0_0] : memref<16x256xf32, #tpu.memory_space<vmem>>, vector<16x128xf32>
    %c0_1 = arith.constant 0 : index
    %c128 = arith.constant 128 : index
    %1 = vector.load %arg2[%c0_1, %c128] : memref<16x256xf32, #tpu.memory_space<vmem>>, vector<16x128xf32>
    %2 = arith.truncf %0 : vector<16x128xf32> to vector<16x128xbf16>
    %c0_2 = arith.constant 0 : index
    %c0_3 = arith.constant 0 : index
    %3 = vector.load %arg3[%c0_2, %c0_3] : memref<128x128xbf16, #tpu.memory_space<vmem>>, vector<128x128xbf16>
    %cst = arith.constant dense<0.000000e+00> : vector<16x128xf32>
    %4 = tpu.matmul %2, %3, %cst {dimension_numbers = #tpu.dot_dimension_numbers<[1], [0], [0], [1], [0, 0, 1, 1], [], []>} : vector<16x128xbf16>, vector<128x128xbf16>, vector<16x128xf32> -> vector<16x128xf32>
    %c0_4 = arith.constant 0 : index
    %c0_5 = arith.constant 0 : index
    %5 = vector.load %arg4[%c0_4, %c0_5] : memref<1x128xf32, #tpu.memory_space<vmem>>, vector<1x128xf32>
    %6 = vector.broadcast %5 : vector<1x128xf32> to vector<16x128xf32>
    %7 = arith.addf %4, %6 : vector<16x128xf32>
    %8 = math.tanh %7 : vector<16x128xf32>
    %c0_6 = arith.constant 0 : index
    %9 = memref.load %arg1[%c0_6] : memref<1xf32, #tpu.memory_space<smem>>
    %cst_7 = arith.constant 0.000000e+00 : f32
    %10 = vector.broadcast %cst_7 : f32 to vector<16x128xf32>
    %11 = arith.subf %10, %1 : vector<16x128xf32>
    %c0_8 = arith.constant 0 : index
    %c0_9 = arith.constant 0 : index
    %12 = vector.load %arg5[%c0_8, %c0_9] : memref<16x256xf32, #tpu.memory_space<vmem>>, vector<16x128xf32>
    tpu.vector_store %arg5[%c0_8, %c0_9], %11 {strides = array<i32>} : memref<16x256xf32, #tpu.memory_space<vmem>>, vector<16x128xf32>,
    %13 = vector.broadcast %9 : f32 to vector<16x128xf32>
    %14 = arith.mulf %13, %1 : vector<16x128xf32>
    %15 = arith.subf %8, %14 : vector<16x128xf32>
    %c0_10 = arith.constant 0 : index
    %c128_11 = arith.constant 128 : index
    %16 = vector.load %arg5[%c0_10, %c128_11] : memref<16x256xf32, #tpu.memory_space<vmem>>, vector<16x128xf32>
    tpu.vector_store %arg5[%c0_10, %c128_11], %15 {strides = array<i32>} : memref<16x256xf32, #tpu.memory_space<vmem>>, vector<16x128xf32>,
    return
  }
  func.func @transform_0(%arg0: i32) -> i32 {
    %c0_i32 = arith.constant 0 : i32
    %c0_i32_0 = arith.constant 0 : i32
    return %c0_i32 : i32
  }
  func.func @transform_1(%arg0: i32) -> (i32, i32) {
    %c0_i32 = arith.constant 0 : i32
    %c0_i32_0 = arith.constant 0 : i32
    return %arg0, %c0_i32 : i32, i32
  }
  func.func @transform_2(%arg0: i32) -> (i32, i32) {
    %c0_i32 = arith.constant 0 : i32
    %c0_i32_0 = arith.constant 0 : i32
    %c0_i32_1 = arith.constant 0 : i32
    return %c0_i32, %c0_i32_0 : i32, i32
  }
  func.func @transform_3(%arg0: i32) -> (i32, i32) {
    %c0_i32 = arith.constant 0 : i32
    %c0_i32_0 = arith.constant 0 : i32
    %c0_i32_1 = arith.constant 0 : i32
    return %c0_i32, %c0_i32_0 : i32, i32
  }
  func.func @transform_4(%arg0: i32) -> (i32, i32) {
    %c0_i32 = arith.constant 0 : i32
    %c0_i32_0 = arith.constant 0 : i32
    return %arg0, %c0_i32 : i32, i32
  }
}

</mosaic_0001>

<bundles_post_ra>
// kernel: tpu_custom_call.1
= control target key start
LH: loop header
LB: loop body
LE: loop exit
PB: predicated region body
PF: predicated region fallthrough
CT: control target
= control target key end

     0   :  { %s998_s0 = inlined_call_operand.<no memory space> [shape: f32[1], index: 0, kind: input, shape index: {}]   ;;  %s999_s1 = inlined_call_operand.hbm [shape: f32[20,256], index: 1, kind: input, shape index: {}]   ;;  %s1000_s2 = inlined_call_operand.hbm [shape: bf16[128,128], index: 2, kind: input, shape index: {}]   ;;  %s1001_s3 = inlined_call_operand.vmem [shape: f32[1,128], index: 3, kind: input, shape index: {}]   ;;  %s1002_s4 = inlined_call_operand.hbm [shape: f32[20,256], index: 4, kind: output, shape index: {}]  }
   0x1   :  { %9 = sst [smem:[#allocation2]] %s998_s0 }
   0x2   :  { %10 = vsyncpa [#allocation4], 0 }
   0x3   :  { %12 = vsyncpa [#allocation4 + $0x1], 0 }
   0x4   :  { %13 = vsyncpa [#allocation7], 0 }
   0x5   :  { %14 = vsyncpa [#allocation5], 0 }
   0x6   :  { %16 = vsyncpa [#allocation5 + $0x1], 0  ;;  %s790_s17 = smov 0   ;;  %s792_s18 = smov 0  }
   0x7   :  { %s794_s19 = smov 0   ;;  %s796_s20 = smov 0  }
   0x8 LB: > { %s811_s0 = sadd.s32 4294967295, %s751_s20   ;;  %s466_s21 = sadd.s32 4294967294, %s751_s20   ;;  %s751_s20 = sphi %s796_s20, %s1019_s20   ;;  %s747_s19 = sphi %s794_s19, %s1018_s19   ;;  %s743_s18 = sphi %s792_s18, %s1017_s18   ;;  %s739_s17 = sphi %s790_s17, %s1016_s17  }
   0x9   : > { %s815_s22 = sadd.s32 1, %s751_s20   ;;  %s50_s23 = sadd.s32 1, %s747_s19 }
   0xa   : > { %s47_s24 = ssub.s32 %s751_s20, %s815_s22  ;;  %p57_p0 = scmp.ne.s32.totalorder %s747_s19, %s743_s18 }
   0xb   : > { %p48_p1 = scmp.eq.s32.totalorder %s47_s24, 0  ;;  %p58_p2 = scmp.eq.s32.totalorder %s751_s20, 0 }
   0xc   : > { %p63_p3 = scmp.ne.s32.totalorder %s743_s18, %s739_s17  ;;  %p1004_p4 = scmp.eq.s32.totalorder %s811_s0, 0 }
   0xd   : > { %s827_s25 = scalar_select %p48_p1, %s747_s19, %s50_s23  }
   0xe   : > { %p829_p5 = por %p58_p2, %p57_p0  ;;  %p835_p6 = por %p1004_p4, %p63_p3 }
   0xf   : > { %p129_p7 = scmp.eq.s32.totalorder %s811_s0, 1  ;;  %p135_p8 = scmp.eq.s32.totalorder %s466_s21, 1 }
  0x10   : > { %p467_p9 = scmp.ge.s32.totalorder %s751_s20, 1  ;;  %p142_p10 = scmp.lt.s32.totalorder %s751_s20, 3 }
  0x11   : > { %p842_p11 = por %p129_p7, %p57_p0  ;;  %p846_p12 = por %p135_p8, %p63_p3 }
  0x12   : > { %p850_p13 = pnand %p467_p9, %p142_p10  ;;  %s156_s7 = sshll.u32 %s1000_s2, 4  ;;  %s157_s7 = int_to_ptr.hbm [resolvable:$true] %s156_s7 }
  0x13   : > { %s1008_s29 = scalar_select %p846_p12, 1, 0 }
  0x14   : > { %p546_p1 = pneg %p850_p13  ;;  %s753_s8 = smov [#allocation6]  }
  0x15   : > { %s158_s9 = sshll.u32 %s753_s8, 4  ;;  %s754_s10 = smov 64   ;;  %s159_s9 = int_to_ptr.vmem [resolvable:$true] %s158_s9 }
  0x16   : > { %p547_p0 = pnand %p546_p1, %p1004_p4  ;;  %s755_s11 = smov 4  }
  0x17   : > { %p1003_p2 = scmp.ge.s32.totalorder %s751_s20, 2 }
  0x18   : > { %549 = dma.hbm_to_vmem [thread:$0]  (!%p547_p0), %s157_s7, 1024, %s159_s9, [#allocation7], %s754_s10, %s754_s10, %s755_s11  }
  0x19   : > { %171 = sbr.rel (%p1003_p2) target bundleno = 66 (0x42), region = 28 }
  0x1e   : > { %174 = sbr.rel (!%p829_p5) target bundleno = 66 (0x42), region = 32  ;;  %s175_s12 = sand.u32 (%p829_p5), 1, %s747_s19  }
  0x1f   : > { %s471_s13 = sshll.u32 (%p829_p5), %s751_s20, 1  ;;  %s470_s14 = sshll.u32 (%p829_p5), %s175_s12, 5 }
  0x20   : > { %s181_s15 = ssub.s32 (%p829_p5), 3, %s471_s13  ;;  %s871_s24 = scalar_lea.sflag (%p829_p5), [#allocation4], %s175_s12 }
  0x21   : > { %p182_p3 = scmp.lt.s32.totalorder (%p829_p5), %s181_s15, 2  ;;  %s179_s5 = scalar_lea.vmem (%p829_p5), [#allocation3], %s470_s14 }
  0x23   : > { %s1021_s15 = smov (!%p182_p3, %s181_s15), 2 }
  0x24   : > { %s526_s16 = sshll.u32 %s1021_s15, 4 }
  0x25   : > { %s186_s21 = ssub.s32 32, %s526_s16 }
  0x26   : > { %s187_s23 = sshll.u32 %s186_s21, 4 }
  0x27   : > { %188 = vsyncadd %s871_s24, %s187_s23  ;;  %p874_p5 = scmp.ne.s32.totalorder %s526_s16, 0  ;;  %s528_s6 = sshll.u32 %s751_s20, 5 }
  0x28   : > { %s192_s9 = scalar_lea.hbm %s999_s1, %s528_s6  ;;  %s882_s10 = sshll.u32 %s179_s5, 4  ;;  %s197_s10 = int_to_ptr.vmem [resolvable:$true] %s882_s10 }
  0x29   : > { %s194_s11 = sshll.u32 %s192_s9, 4  ;;  %s478_s12 = sshll.u32 %s1021_s15, 8  ;;  %s885_s11 = int_to_ptr.hbm [resolvable:$true] %s194_s11 }
  0x2a   : > { %s631_s13 = sshra.s32 %s885_s11, 4  ;;  %s633_s14 = sshrl.u32 %s478_s12, 4  ;;  %s632_s13 = int_to_ptr.hbm [resolvable:$true] %s631_s13 }
  0x2b   : > { %s638_s16 = scalar_lea.hbm %s632_s13, %s633_s14  ;;  %s642_s5 = scalar_lea.hbm %s999_s1, 48 }
  0x2c   : > { %p639_p7 = scmp.ne.s32.totalorder %s632_s13, %s638_s16  ;;  %p643_p10 = scmp.lt.s32.totalorder %s632_s13, %s999_s1 }
  0x2d   : > { %p644_p1 = scmp.lt.s32.totalorder %s642_s5, %s638_s16 }
  0x2e   : > { %p640_p8 = pnand %p639_p7, %p874_p5 }
  0x2f   : > { %p645_p0 = por %p644_p1, %p643_p10 }
  0x30   : > { %p641_p9 = pneg %p640_p8 }
  0x32   : > { %p646_p3 = pnand %p645_p0, %p641_p9 }
  0x34   : > { %649 = shalt.err (!%p646_p3)
}
  0x35   : > { %s650_s8 = sshra.s32 %s197_s10, 4  ;;  %s756_s21 = smov [#allocation3]   ;;  %s651_s8 = int_to_ptr.vmem [resolvable:$true] %s650_s8 }
  0x36   : > { %s657_s9 = scalar_lea.vmem %s651_s8, %s633_s14  ;;  %s661_s23 = scalar_lea.vmem %s756_s21, 64 }
  0x37   : > { %p658_p7 = scmp.ne.s32.totalorder %s651_s8, %s657_s9  ;;  %p663_p4 = scmp.lt.s32.totalorder %s661_s23, %s657_s9 }
  0x39   : > { %p659_p8 = pnand %p658_p7, %p874_p5 }
  0x3b   : > { %p660_p2 = pneg %p659_p8 }
  0x3d   : > { %p665_p12 = pnand %p663_p4, %p660_p2 }
  0x3f   : > { %668 = shalt.err (!%p665_p12)
}
  0x40   : > { %s757_s13 = smov 256   ;;  %s758_s16 = smov 16  }
  0x41   : > { %202 = dma.hbm_to_vmem [thread:$0]  (%p874_p5), %s885_s11, %s478_s12, %s197_s10, %s871_s24, %s757_s13, %s757_s13, %s758_s16  }
  0x42 PF: > { %208 = sbr.rel (%p850_p13) target bundleno = 284 (0x11c), region = 36  ;;  %s914_s14 = sand.u32 (!%p850_p13), 1, %s743_s18  }
  0x43   : > { %s480_s5 = sshll.u32 (!%p850_p13), %s914_s14, 5  ;;  %s211_s6 = scalar_lea.sflag (!%p850_p13), [#allocation4], %s914_s14 }
  0x44   : > { %s214_s7 = scalar_lea.vmem (!%p850_p13), [#allocation3], %s480_s5 }
  0x47   : > { %726 = dma.done.wait (%p835_p6), %s211_s6, 512  }
  0x48   : > { %728 = vsyncadd (%p835_p6), %s211_s6, 4294966784  ;;  %p1011_p4 = scmp.eq.s32.totalorder %s811_s0, 0 }
  0x4a   : > { %730 = dma.done.wait (%p1011_p4), [#allocation7], 1024   ;;  %p1012_p12 = pmov %p1011_p4 }
  0x4b   : > { %v536_v0 = vld [vmem:[#allocation6 + $0x38] sm:$0xff]  ;;  %v535_v1 = vld [vmem:[#allocation6 + $0x30] sm:$0xff]  ;;  %v534_v2 = vld [vmem:[#allocation6 + $0x28] sm:$0xff]  ;;  %s926_s27 = scalar_lea.vmem [#allocation8], %s480_s5  ;;  %s346_s30 = sld [smem:[#allocation2]] }
  0x4c   : > { %732 = vsyncadd (%p1012_p12), [#allocation7], 4294966272  ;;  %330 = vmatpush.bf16.msra.mxu0 %v536_v0  ;;  %v533_v3 = vld [vmem:[#allocation6 + $0x20] sm:$0xff]  ;;  %v532_v4 = vld [vmem:[#allocation6 + $0x18] sm:$0xff]  ;;  %s359_s26 = scalar_lea.sflag [#allocation5], %s914_s14  ;;  %s516_s10 = sshll.u32 (%p842_p11), %s811_s0, 1 }
  0x4d   : > { %v531_v5 = vld [vmem:[#allocation6 + $0x10] sm:$0xff]  ;;  %v530_v6 = vld [vmem:[#allocation6 + $0x8] sm:$0xff]  ;;  %v529_v7 = vld [vmem:[#allocation6] sm:$0xff]  ;;  %s367_s11 = ssub.s32 (%p842_p11), 3, %s516_s10 }
  0x4e   : > { %v257_v8 = vld [vmem:[%s214_s7] sm:$0xff]  ;;  %v258_v9 = vld [vmem:[%s214_s7 + $0x10] sm:$0xff]  ;;  %v259_v11 = vld [vmem:[%s214_s7 + $0x8] sm:$0xff]  ;;  %p368_p6 = scmp.lt.s32.totalorder (%p842_p11), %s367_s11, 2 }
  0x4f   : > { %v261_v10 = vpack.c.bf16 %v258_v9, %v257_v8  ;;  %v347_v12 = vsub.f32 0.0, %v259_v11  ;;  %v260_v13 = vld [vmem:[%s214_s7 + $0x18] sm:$0xff]  ;;  %v596_v15 = vld [vmem:[%s1001_s3] ss:$0 sm:$0xff] }
  0x50   : > { %331 = vmatpush.bf16.msra.mxu0 %v535_v1  ;;  %v348_v14 = vsub.f32 0.0, %v260_v13 }
  0x51   : > { %349 = vst [vmem:[%s926_s27] sm:$0xff] %v347_v12  ;;  %v351_v18 = vstv %s346_s30 }
  0x52   : > { %350 = vst [vmem:[%s926_s27 + $0x10] sm:$0xff] %v348_v14  ;;  %v352_v19 = vmul.f32 %v351_v18, %v259_v11  ;;  %v353_v24 = vmul.f32 %v351_v18, %v260_v13 }
  0x54   : > { %332 = vmatpush.bf16.msra.mxu0 %v534_v2 }
  0x58   : > { %333 = vmatpush.bf16.msra.mxu0 %v533_v3 }
  0x5c   : > { %334 = vmatpush.bf16.msra.mxu0 %v532_v4 }
  0x60   : > { %335 = vmatpush.bf16.msra.mxu0 %v531_v5 }
  0x64   : > { %336 = vmatpush.bf16.msra.mxu0 %v530_v6 }
  0x68   : > { %337 = vmatpush.bf16.msra.mxu0 %v529_v7 }
  0x6b   : > { %338 = vmatmul.bf16.vlgmr.msra.gmra.mxu0 %v261_v10 }
  0xe8   : > { %v339_v16 = vpop.f32.mrf.mxu0 }
  0xe9   : > { %v340_v17 = vadd.f32 %v596_v15, %v339_v16 }
  0xeb   : > { %597 = vtanh.f32 %v340_v17 }
  0xf0   : > { %v341_v20 = vpop.f32.mrf.mxu0 }
  0xf1   : > { %v598_v21 = vpop.eup %597  ;;  %v342_v22 = vadd.f32 %v596_v15, %v341_v20 }
  0xf2   : > { %v354_v23 = vsub.f32 %v598_v21, %v352_v19 }
  0xf3   : > { %599 = vtanh.f32 %v342_v22 }
  0xf4   : > { %356 = vst [vmem:[%s926_s27 + $0x8] sm:$0xff] %v354_v23 }
  0xf8   : > { %365 = sbr.rel (!%p842_p11) target bundleno = 284 (0x11c), region = 48 }
  0xf9   : > { %v600_v25 = vpop.eup %599 }
  0xfa   : > { %v355_v26 = vsub.f32 %v600_v25, %v353_v24 }
  0xfc   : > { %357 = vst [vmem:[%s926_s27 + $0x18] sm:$0xff] %v355_v26 }
  0xfd   : > { %s1023_s11 = smov (!%p368_p6, %s367_s11), 2 }
  0xfe   : > { %s537_s12 = sshll.u32 %s1023_s11, 4 }
  0xff   : > { %s372_s8 = ssub.s32 32, %s537_s12 }
 0x100   : > { %s373_s9 = sshll.u32 %s372_s8, 4 }
 0x101   : > { %374 = vsyncadd %s359_s26, %s373_s9  ;;  %p944_p13 = scmp.ne.s32.totalorder %s537_s12, 0  ;;  %s539_s21 = sshll.u32 %s811_s0, 5 }
 0x102   : > { %s378_s16 = scalar_lea.hbm %s1002_s4, %s539_s21  ;;  %s380_s5 = sshll.u32 %s926_s27, 4  ;;  %s953_s5 = int_to_ptr.vmem [resolvable:$true] %s380_s5 }
 0x103   : > { %s382_s6 = sshll.u32 %s378_s16, 4  ;;  %s523_s7 = sshll.u32 %s1023_s11, 8  ;;  %s955_s6 = int_to_ptr.hbm [resolvable:$true] %s382_s6 }
 0x104   : > { %s670_s30 = sshra.s32 %s953_s5, 4  ;;  %s672_s15 = sshrl.u32 %s523_s7, 4  ;;  %s671_s30 = int_to_ptr.vmem [resolvable:$true] %s670_s30 }
 0x105   : > { %s677_s24 = scalar_lea.vmem %s671_s30, %s672_s15  ;;  %s759_s0 = smov [#allocation8]  }
 0x106   : > { %p678_p11 = scmp.ne.s32.totalorder %s671_s30, %s677_s24  ;;  %s681_s10 = scalar_lea.vmem %s759_s0, 64 }
 0x107   : > { %p683_p9 = scmp.lt.s32.totalorder %s681_s10, %s677_s24 }
 0x108   : > { %p679_p2 = pnand %p678_p11, %p944_p13 }
 0x10a   : > { %p680_p5 = pneg %p679_p2 }
 0x10c   : > { %p685_p10 = pnand %p683_p9, %p680_p5 }
 0x10e   : > { %688 = shalt.err (!%p685_p10)
}
 0x10f   : > { %s689_s27 = sshra.s32 %s955_s6, 4  ;;  %s700_s21 = scalar_lea.hbm %s1002_s4, 48  ;;  %s690_s27 = int_to_ptr.hbm [resolvable:$true] %s689_s27 }
 0x110   : > { %s696_s12 = scalar_lea.hbm %s690_s27, %s672_s15  ;;  %p701_p7 = scmp.lt.s32.totalorder %s690_s27, %s1002_s4 }
 0x111   : > { %p697_p1 = scmp.ne.s32.totalorder %s690_s27, %s696_s12  ;;  %p702_p8 = scmp.lt.s32.totalorder %s700_s21, %s696_s12 }
 0x113   : > { %p698_p0 = pnand %p697_p1, %p944_p13  ;;  %p703_p4 = por %p702_p8, %p701_p7 }
 0x115   : > { %p699_p3 = pneg %p698_p0 }
 0x117   : > { %p704_p12 = pnand %p703_p4, %p699_p3 }
 0x119   : > { %707 = shalt.err (!%p704_p12)
}
 0x11a   : > { %s760_s16 = smov 256   ;;  %s761_s30 = smov 16  }
 0x11b   : > { %388 = dma.vmem_to_hbm [thread:$0]  (%p944_p13), %s953_s5, %s523_s7, %s955_s6, %s359_s26, %s760_s16, %s760_s16, %s761_s30  }
 0x11c PF: > { %s397_s15 = sand.u32 1, %s739_s17   ;;  %p1014_p6 = scmp.ne.s32.totalorder %s1008_s29, 0 }
 0x11d   : > { %p1015_p11 = scmp.ge.s32.totalorder %s751_s20, 2  ;;  %s398_s24 = scalar_lea.sflag [#allocation5], %s397_s15 }
 0x11f   : > { %p551_p2 = pnand %p1015_p11, %p1014_p6 }
 0x121   : > { %p552_p5 = pneg %p551_p2 }
 0x123   : > { %734 = dma.done.wait (%p552_p5), %s398_s24, 512  }
 0x124   : > { %736 = vsyncadd (%p552_p5), %s398_s24, 4294966784  ;;  %p19_p9 = scmp.ge.s32.totalorder %s815_s22, 4   ;;  %s1016_s17 = smov %s743_s18 }
 0x125   : > { %s1017_s18 = smov %s747_s19  ;;  %s1018_s19 = smov %s827_s25 }
 0x126   : > { %s1019_s20 = smov %s815_s22  ;;  %21 = sbr.rel (!%p19_p9) target bundleno = 8 (0x8), region = 85 }
 0x12b   :  { %404 = vsyncpa [#allocation4], 1 }
 0x12c   :  { %406 = vsyncpa [#allocation4 + $0x1], 1 }
 0x12d   :  { %407 = vsyncpa [#allocation7], 1 }
 0x12e   :  { %408 = vsyncpa [#allocation5], 1 }
 0x12f   :  { %410 = vsyncpa [#allocation5 + $0x1], 1 }

// kernel: tpu_custom_call.1
= control target key start
LH: loop header
LB: loop body
LE: loop exit
PB: predicated region body
PF: predicated region fallthrough
CT: control target
= control target key end

     0   :  { %s998_s0 = inlined_call_operand.<no memory space> [shape: f32[1], index: 0, kind: input, shape index: {}]   ;;  %s999_s1 = inlined_call_operand.hbm [shape: f32[20,256], index: 1, kind: input, shape index: {}]   ;;  %s1000_s2 = inlined_call_operand.hbm [shape: bf16[128,128], index: 2, kind: input, shape index: {}]   ;;  %s1001_s3 = inlined_call_operand.vmem [shape: f32[1,128], index: 3, kind: input, shape index: {}]   ;;  %s1002_s4 = inlined_call_operand.hbm [shape: f32[20,256], index: 4, kind: output, shape index: {}]  }
   0x1   :  { %9 = sst [smem:[#allocation2]] %s998_s0 }
   0x2   :  { %10 = vsyncpa [#allocation4], 0 }
   0x3   :  { %12 = vsyncpa [#allocation4 + $0x1], 0 }
   0x4   :  { %13 = vsyncpa [#allocation7], 0 }
   0x5   :  { %14 = vsyncpa [#allocation5], 0 }
   0x6   :  { %16 = vsyncpa [#allocation5 + $0x1], 0  ;;  %s790_s17 = smov 0   ;;  %s792_s18 = smov 0  }
   0x7   :  { %s794_s19 = smov 0   ;;  %s796_s20 = smov 0  }
   0x8 LB: > { %s811_s0 = sadd.s32 4294967295, %s751_s20   ;;  %s466_s21 = sadd.s32 4294967294, %s751_s20   ;;  %s751_s20 = sphi %s796_s20, %s1019_s20   ;;  %s747_s19 = sphi %s794_s19, %s1018_s19   ;;  %s743_s18 = sphi %s792_s18, %s1017_s18   ;;  %s739_s17 = sphi %s790_s17, %s1016_s17  }
   0x9   : > { %s815_s22 = sadd.s32 1, %s751_s20   ;;  %s50_s23 = sadd.s32 1, %s747_s19 }
   0xa   : > { %s47_s24 = ssub.s32 %s751_s20, %s815_s22  ;;  %p57_p0 = scmp.ne.s32.totalorder %s747_s19, %s743_s18 }
   0xb   : > { %p48_p1 = scmp.eq.s32.totalorder %s47_s24, 0  ;;  %p58_p2 = scmp.eq.s32.totalorder %s751_s20, 0 }
   0xc   : > { %p63_p3 = scmp.ne.s32.totalorder %s743_s18, %s739_s17  ;;  %p1004_p4 = scmp.eq.s32.totalorder %s811_s0, 0 }
   0xd   : > { %s827_s25 = scalar_select %p48_p1, %s747_s19, %s50_s23  }
   0xe   : > { %p829_p5 = por %p58_p2, %p57_p0  ;;  %p835_p6 = por %p1004_p4, %p63_p3 }
   0xf   : > { %p129_p7 = scmp.eq.s32.totalorder %s811_s0, 1  ;;  %p135_p8 = scmp.eq.s32.totalorder %s466_s21, 1 }
  0x10   : > { %p467_p9 = scmp.ge.s32.totalorder %s751_s20, 1  ;;  %p142_p10 = scmp.lt.s32.totalorder %s751_s20, 3 }
  0x11   : > { %p842_p11 = por %p129_p7, %p57_p0  ;;  %p846_p12 = por %p135_p8, %p63_p3 }
  0x12   : > { %p850_p13 = pnand %p467_p9, %p142_p10  ;;  %s156_s7 = sshll.u32 %s1000_s2, 4  ;;  %s157_s7 = int_to_ptr.hbm [resolvable:$true] %s156_s7 }
  0x13   : > { %s1008_s29 = scalar_select %p846_p12, 1, 0 }
  0x14   : > { %p546_p1 = pneg %p850_p13  ;;  %s753_s8 = smov [#allocation6]  }
  0x15   : > { %s158_s9 = sshll.u32 %s753_s8, 4  ;;  %s754_s10 = smov 64   ;;  %s159_s9 = int_to_ptr.vmem [resolvable:$true] %s158_s9 }
  0x16   : > { %p547_p0 = pnand %p546_p1, %p1004_p4  ;;  %s755_s11 = smov 4  }
  0x17   : > { %p1003_p2 = scmp.ge.s32.totalorder %s751_s20, 2 }
  0x18   : > { %549 = dma.hbm_to_vmem [thread:$0]  (!%p547_p0), %s157_s7, 1024, %s159_s9, [#allocation7], %s754_s10, %s754_s10, %s755_s11  }
  0x19   : > { %171 = sbr.rel (%p1003_p2) target bundleno = 66 (0x42), region = 28 }
  0x1e   : > { %174 = sbr.rel (!%p829_p5) target bundleno = 66 (0x42), region = 32  ;;  %s175_s12 = sand.u32 (%p829_p5), 1, %s747_s19  }
  0x1f   : > { %s471_s13 = sshll.u32 (%p829_p5), %s751_s20, 1  ;;  %s470_s14 = sshll.u32 (%p829_p5), %s175_s12, 5 }
  0x20   : > { %s181_s15 = ssub.s32 (%p829_p5), 3, %s471_s13  ;;  %s871_s24 = scalar_lea.sflag (%p829_p5), [#allocation4], %s175_s12 }
  0x21   : > { %p182_p3 = scmp.lt.s32.totalorder (%p829_p5), %s181_s15, 2  ;;  %s179_s5 = scalar_lea.vmem (%p829_p5), [#allocation3], %s470_s14 }
  0x23   : > { %s1021_s15 = smov (!%p182_p3, %s181_s15), 2 }
  0x24   : > { %s526_s16 = sshll.u32 %s1021_s15, 4 }
  0x25   : > { %s186_s21 = ssub.s32 32, %s526_s16 }
  0x26   : > { %s187_s23 = sshll.u32 %s186_s21, 4 }
  0x27   : > { %188 = vsyncadd %s871_s24, %s187_s23  ;;  %p874_p5 = scmp.ne.s32.totalorder %s526_s16, 0  ;;  %s528_s6 = sshll.u32 %s751_s20, 5 }
  0x28   : > { %s192_s9 = scalar_lea.hbm %s999_s1, %s528_s6  ;;  %s882_s10 = sshll.u32 %s179_s5, 4  ;;  %s197_s10 = int_to_ptr.vmem [resolvable:$true] %s882_s10 }
  0x29   : > { %s194_s11 = sshll.u32 %s192_s9, 4  ;;  %s478_s12 = sshll.u32 %s1021_s15, 8  ;;  %s885_s11 = int_to_ptr.hbm [resolvable:$true] %s194_s11 }
  0x2a   : > { %s631_s13 = sshra.s32 %s885_s11, 4  ;;  %s633_s14 = sshrl.u32 %s478_s12, 4  ;;  %s632_s13 = int_to_ptr.hbm [resolvable:$true] %s631_s13 }
  0x2b   : > { %s638_s16 = scalar_lea.hbm %s632_s13, %s633_s14  ;;  %s642_s5 = scalar_lea.hbm %s999_s1, 48 }
  0x2c   : > { %p639_p7 = scmp.ne.s32.totalorder %s632_s13, %s638_s16  ;;  %p643_p10 = scmp.lt.s32.totalorder %s632_s13, %s999_s1 }
  0x2d   : > { %p644_p1 = scmp.lt.s32.totalorder %s642_s5, %s638_s16 }
  0x2e   : > { %p640_p8 = pnand %p639_p7, %p874_p5 }
  0x2f   : > { %p645_p0 = por %p644_p1, %p643_p10 }
  0x30   : > { %p641_p9 = pneg %p640_p8 }
  0x32   : > { %p646_p3 = pnand %p645_p0, %p641_p9 }
  0x34   : > { %649 = shalt.err (!%p646_p3)
}
  0x35   : > { %s650_s8 = sshra.s32 %s197_s10, 4  ;;  %s756_s21 = smov [#allocation3]   ;;  %s651_s8 = int_to_ptr.vmem [resolvable:$true] %s650_s8 }
  0x36   : > { %s657_s9 = scalar_lea.vmem %s651_s8, %s633_s14  ;;  %s661_s23 = scalar_lea.vmem %s756_s21, 64 }
  0x37   : > { %p658_p7 = scmp.ne.s32.totalorder %s651_s8, %s657_s9  ;;  %p663_p4 = scmp.lt.s32.totalorder %s661_s23, %s657_s9 }
  0x39   : > { %p659_p8 = pnand %p658_p7, %p874_p5 }
  0x3b   : > { %p660_p2 = pneg %p659_p8 }
  0x3d   : > { %p665_p12 = pnand %p663_p4, %p660_p2 }
  0x3f   : > { %668 = shalt.err (!%p665_p12)
}
  0x40   : > { %s757_s13 = smov 256   ;;  %s758_s16 = smov 16  }
  0x41   : > { %202 = dma.hbm_to_vmem [thread:$0]  (%p874_p5), %s885_s11, %s478_s12, %s197_s10, %s871_s24, %s757_s13, %s757_s13, %s758_s16  }
  0x42 PF: > { %208 = sbr.rel (%p850_p13) target bundleno = 284 (0x11c), region = 36  ;;  %s914_s14 = sand.u32 (!%p850_p13), 1, %s743_s18  }
  0x43   : > { %s480_s5 = sshll.u32 (!%p850_p13), %s914_s14, 5  ;;  %s211_s6 = scalar_lea.sflag (!%p850_p13), [#allocation4], %s914_s14 }
  0x44   : > { %s214_s7 = scalar_lea.vmem (!%p850_p13), [#allocation3], %s480_s5 }
  0x47   : > { %726 = dma.done.wait (%p835_p6), %s211_s6, 512  }
  0x48   : > { %728 = vsyncadd (%p835_p6), %s211_s6, 4294966784  ;;  %p1011_p4 = scmp.eq.s32.totalorder %s811_s0, 0 }
  0x4a   : > { %730 = dma.done.wait (%p1011_p4), [#allocation7], 1024   ;;  %p1012_p12 = pmov %p1011_p4 }
  0x4b   : > { %v536_v0 = vld [vmem:[#allocation6 + $0x38] sm:$0xff]  ;;  %v535_v1 = vld [vmem:[#allocation6 + $0x30] sm:$0xff]  ;;  %v534_v2 = vld [vmem:[#allocation6 + $0x28] sm:$0xff]  ;;  %s926_s27 = scalar_lea.vmem [#allocation8], %s480_s5  ;;  %s346_s30 = sld [smem:[#allocation2]] }
  0x4c   : > { %732 = vsyncadd (%p1012_p12), [#allocation7], 4294966272  ;;  %330 = vmatpush.bf16.msra.mxu0 %v536_v0  ;;  %v533_v3 = vld [vmem:[#allocation6 + $0x20] sm:$0xff]  ;;  %v532_v4 = vld [vmem:[#allocation6 + $0x18] sm:$0xff]  ;;  %s359_s26 = scalar_lea.sflag [#allocation5], %s914_s14  ;;  %s516_s10 = sshll.u32 (%p842_p11), %s811_s0, 1 }
  0x4d   : > { %v531_v5 = vld [vmem:[#allocation6 + $0x10] sm:$0xff]  ;;  %v530_v6 = vld [vmem:[#allocation6 + $0x8] sm:$0xff]  ;;  %v529_v7 = vld [vmem:[#allocation6] sm:$0xff]  ;;  %s367_s11 = ssub.s32 (%p842_p11), 3, %s516_s10 }
  0x4e   : > { %v257_v8 = vld [vmem:[%s214_s7] sm:$0xff]  ;;  %v258_v9 = vld [vmem:[%s214_s7 + $0x10] sm:$0xff]  ;;  %v259_v11 = vld [vmem:[%s214_s7 + $0x8] sm:$0xff]  ;;  %p368_p6 = scmp.lt.s32.totalorder (%p842_p11), %s367_s11, 2 }
  0x4f   : > { %v261_v10 = vpack.c.bf16 %v258_v9, %v257_v8  ;;  %v347_v12 = vsub.f32 0.0, %v259_v11  ;;  %v260_v13 = vld [vmem:[%s214_s7 + $0x18] sm:$0xff]  ;;  %v596_v15 = vld [vmem:[%s1001_s3] ss:$0 sm:$0xff] }
  0x50   : > { %331 = vmatpush.bf16.msra.mxu0 %v535_v1  ;;  %v348_v14 = vsub.f32 0.0, %v260_v13 }
  0x51   : > { %349 = vst [vmem:[%s926_s27] sm:$0xff] %v347_v12  ;;  %v351_v18 = vstv %s346_s30 }
  0x52   : > { %350 = vst [vmem:[%s926_s27 + $0x10] sm:$0xff] %v348_v14  ;;  %v352_v19 = vmul.f32 %v351_v18, %v259_v11  ;;  %v353_v24 = vmul.f32 %v351_v18, %v260_v13 }
  0x54   : > { %332 = vmatpush.bf16.msra.mxu0 %v534_v2 }
  0x58   : > { %333 = vmatpush.bf16.msra.mxu0 %v533_v3 }
  0x5c   : > { %334 = vmatpush.bf16.msra.mxu0 %v532_v4 }
  0x60   : > { %335 = vmatpush.bf16.msra.mxu0 %v531_v5 }
  0x64   : > { %336 = vmatpush.bf16.msra.mxu0 %v530_v6 }
  0x68   : > { %337 = vmatpush.bf16.msra.mxu0 %v529_v7 }
  0x6b   : > { %338 = vmatmul.bf16.vlgmr.msra.gmra.mxu0 %v261_v10 }
  0xe8   : > { %v339_v16 = vpop.f32.mrf.mxu0 }
  0xe9   : > { %v340_v17 = vadd.f32 %v596_v15, %v339_v16 }
  0xeb   : > { %597 = vtanh.f32 %v340_v17 }
  0xf0   : > { %v341_v20 = vpop.f32.mrf.mxu0 }
  0xf1   : > { %v598_v21 = vpop.eup %597  ;;  %v342_v22 = vadd.f32 %v596_v15, %v341_v20 }
  0xf2   : > { %v354_v23 = vsub.f32 %v598_v21, %v352_v19 }
  0xf3   : > { %599 = vtanh.f32 %v342_v22 }
  0xf4   : > { %356 = vst [vmem:[%s926_s27 + $0x8] sm:$0xff] %v354_v23 }
  0xf8   : > { %365 = sbr.rel (!%p842_p11) target bundleno = 284 (0x11c), region = 48 }
  0xf9   : > { %v600_v25 = vpop.eup %599 }
  0xfa   : > { %v355_v26 = vsub.f32 %v600_v25, %v353_v24 }
  0xfc   : > { %357 = vst [vmem:[%s926_s27 + $0x18] sm:$0xff] %v355_v26 }
  0xfd   : > { %s1023_s11 = smov (!%p368_p6, %s367_s11), 2 }
  0xfe   : > { %s537_s12 = sshll.u32 %s1023_s11, 4 }
  0xff   : > { %s372_s8 = ssub.s32 32, %s537_s12 }
 0x100   : > { %s373_s9 = sshll.u32 %s372_s8, 4 }
 0x101   : > { %374 = vsyncadd %s359_s26, %s373_s9  ;;  %p944_p13 = scmp.ne.s32.totalorder %s537_s12, 0  ;;  %s539_s21 = sshll.u32 %s811_s0, 5 }
 0x102   : > { %s378_s16 = scalar_lea.hbm %s1002_s4, %s539_s21  ;;  %s380_s5 = sshll.u32 %s926_s27, 4  ;;  %s953_s5 = int_to_ptr.vmem [resolvable:$true] %s380_s5 }
 0x103   : > { %s382_s6 = sshll.u32 %s378_s16, 4  ;;  %s523_s7 = sshll.u32 %s1023_s11, 8  ;;  %s955_s6 = int_to_ptr.hbm [resolvable:$true] %s382_s6 }
 0x104   : > { %s670_s30 = sshra.s32 %s953_s5, 4  ;;  %s672_s15 = sshrl.u32 %s523_s7, 4  ;;  %s671_s30 = int_to_ptr.vmem [resolvable:$true] %s670_s30 }
 0x105   : > { %s677_s24 = scalar_lea.vmem %s671_s30, %s672_s15  ;;  %s759_s0 = smov [#allocation8]  }
 0x106   : > { %p678_p11 = scmp.ne.s32.totalorder %s671_s30, %s677_s24  ;;  %s681_s10 = scalar_lea.vmem %s759_s0, 64 }
 0x107   : > { %p683_p9 = scmp.lt.s32.totalorder %s681_s10, %s677_s24 }
 0x108   : > { %p679_p2 = pnand %p678_p11, %p944_p13 }
 0x10a   : > { %p680_p5 = pneg %p679_p2 }
 0x10c   : > { %p685_p10 = pnand %p683_p9, %p680_p5 }
 0x10e   : > { %688 = shalt.err (!%p685_p10)
}
 0x10f   : > { %s689_s27 = sshra.s32 %s955_s6, 4  ;;  %s700_s21 = scalar_lea.hbm %s1002_s4, 48  ;;  %s690_s27 = int_to_ptr.hbm [resolvable:$true] %s689_s27 }
 0x110   : > { %s696_s12 = scalar_lea.hbm %s690_s27, %s672_s15  ;;  %p701_p7 = scmp.lt.s32.totalorder %s690_s27, %s1002_s4 }
 0x111   : > { %p697_p1 = scmp.ne.s32.totalorder %s690_s27, %s696_s12  ;;  %p702_p8 = scmp.lt.s32.totalorder %s700_s21, %s696_s12 }
 0x113   : > { %p698_p0 = pnand %p697_p1, %p944_p13  ;;  %p703_p4 = por %p702_p8, %p701_p7 }
 0x115   : > { %p699_p3 = pneg %p698_p0 }
 0x117   : > { %p704_p12 = pnand %p703_p4, %p699_p3 }
 0x119   : > { %707 = shalt.err (!%p704_p12)
}
 0x11a   : > { %s760_s16 = smov 256   ;;  %s761_s30 = smov 16  }
 0x11b   : > { %388 = dma.vmem_to_hbm [thread:$0]  (%p944_p13), %s953_s5, %s523_s7, %s955_s6, %s359_s26, %s760_s16, %s760_s16, %s761_s30  }
 0x11c PF: > { %s397_s15 = sand.u32 1, %s739_s17   ;;  %p1014_p6 = scmp.ne.s32.totalorder %s1008_s29, 0 }
 0x11d   : > { %p1015_p11 = scmp.ge.s32.totalorder %s751_s20, 2  ;;  %s398_s24 = scalar_lea.sflag [#allocation5], %s397_s15 }
 0x11f   : > { %p551_p2 = pnand %p1015_p11, %p1014_p6 }
 0x121   : > { %p552_p5 = pneg %p551_p2 }
 0x123   : > { %734 = dma.done.wait (%p552_p5), %s398_s24, 512  }
 0x124   : > { %736 = vsyncadd (%p552_p5), %s398_s24, 4294966784  ;;  %p19_p9 = scmp.ge.s32.totalorder %s815_s22, 4   ;;  %s1016_s17 = smov %s743_s18 }
 0x125   : > { %s1017_s18 = smov %s747_s19  ;;  %s1018_s19 = smov %s827_s25 }
 0x126   : > { %s1019_s20 = smov %s815_s22  ;;  %21 = sbr.rel (!%p19_p9) target bundleno = 8 (0x8), region = 85 }
 0x12b   :  { %404 = vsyncpa [#allocation4], 1 }
 0x12c   :  { %406 = vsyncpa [#allocation4 + $0x1], 1 }
 0x12d   :  { %407 = vsyncpa [#allocation7], 1 }
 0x12e   :  { %408 = vsyncpa [#allocation5], 1 }
 0x12f   :  { %410 = vsyncpa [#allocation5 + $0x1], 1 }

</bundles_post_ra>
